<compile_context>
chip_gen: v7x
topology: tpu7x:2x2x1
jax: 0.10.0
libtpu: 0.0.40
codegen_flags: <defaults>
</compile_context>

<pallas_src>
import jax
import jax.numpy as jnp
from jax.experimental import pallas as pl
from jax.experimental.pallas import tpu as pltpu


def _round_up(n, m):
    return ((n + m - 1) // m) * m


def _decoder_kernel(x_ref,
                    w1_ref, b1_ref,
                    w2_ref, b2_ref,
                    w3_ref, b3_ref,
                    w4_ref, b4_ref,
                    o_ref):
    # MXU operand dtype follows the weights (bf16 or f32); accumulation and
    # all elementwise (bias add, ReLU) stay in f32 (portable to v5e which has
    # no bf16 VPU).
    # TODO(synk): on v6e/v7x only, doing the bias-add/ReLU in bf16 would halve
    # the vreg footprint of the (block_b, 8L) intermediate at large block_b.
    mxu_dtype = w1_ref.dtype
    h = x_ref[...].astype(mxu_dtype)

    # Layer 1: Linear(L, 2L) + ReLU
    h = jnp.dot(h, w1_ref[...], preferred_element_type=jnp.float32) + b1_ref[...]
    h = jnp.maximum(h, 0.0).astype(mxu_dtype)

    # Layer 2: Linear(2L, 4L) + ReLU
    h = jnp.dot(h, w2_ref[...], preferred_element_type=jnp.float32) + b2_ref[...]
    h = jnp.maximum(h, 0.0).astype(mxu_dtype)

    # Layer 3: Linear(4L, 8L) + ReLU
    h = jnp.dot(h, w3_ref[...], preferred_element_type=jnp.float32) + b3_ref[...]
    h = jnp.maximum(h, 0.0).astype(mxu_dtype)

    # Layer 4: Linear(8L, input_dim_padded)  (no activation)
    h = jnp.dot(h, w4_ref[...], preferred_element_type=jnp.float32) + b4_ref[...]

    o_ref[...] = h.astype(o_ref.dtype)


def prepare_decoder_params(params, *, use_bf16=True):
    """One-time weight preparation (do NOT call per forward step).

    Casts weights to the MXU operand dtype (bf16 default: native on v6e/v7x,
    fine on v5e's MXU, f32 accumulation preserved in-kernel) and zero-pads the
    last layer's output features to a multiple of 128 for lane-dense stores.
    Note: the bf16 path also casts x to bf16 inside the kernel, so layer-1
    inputs lose precision beyond just the weights.
    """
    out_dim = params["w4"].shape[1]
    padded_out = _round_up(out_dim, 128)
    w4, b4 = params["w4"], params["b4"]
    if padded_out != out_dim:
        w4 = jnp.pad(w4, ((0, 0), (0, padded_out - out_dim)))
        b4 = jnp.pad(b4, ((0, 0), (0, padded_out - out_dim)))

    mxu_dtype = jnp.bfloat16 if use_bf16 else jnp.float32
    weights = tuple(w.astype(mxu_dtype)
                    for w in (params["w1"], params["w2"], params["w3"], w4))
    biases = tuple(b.astype(jnp.float32)
                   for b in (params["b1"], params["b2"], params["b3"], b4))
    return {
        "weights": weights,
        "biases": biases,
        "latent_dim": params["w1"].shape[0],
        "out_dim": out_dim,
        "padded_out": padded_out,
        "use_bf16": use_bf16,
    }


def decoder_forward(x, prepared, *, block_b=None, slice_output=True):
    """Run the Decoder MLP as a batch-tiled Pallas kernel.

    x:        (B, latent_dim) float32
    prepared: output of prepare_decoder_params (weights already cast/padded).
    block_b:  batch tile size override (rows per grid step).
    slice_output: if False, return the (padded_b, padded_out) lane-dense slab
              (avoids the extra output copy when downstream accepts it).
    """
    B, L = x.shape
    assert L == prepared["latent_dim"], (L, prepared["latent_dim"])
    weights, biases = prepared["weights"], prepared["biases"]
    out_dim, padded_out = prepared["out_dim"], prepared["padded_out"]
    use_bf16 = prepared["use_bf16"]

    # ---- Batch tiling ----
    # bf16 packs 16 rows per sublane tile, f32 packs 8. Large tiles amortize
    # the ~0.35 us/step grid overhead; keeping >=4 tiles at large B lets the
    # "parallel" axis shard across both v7x TensorCores and keeps the x/out
    # DMA pipeline overlapped. block_b is re-derived from num_tiles so batch
    # padding stays near zero even for awkward B.
    row_mult = 16 if use_bf16 else 8
    rows = _round_up(B, row_mult)
    if block_b is None:
        block_b = max(256, min(2048, pl.cdiv(rows, 4)))
    block_b = max(row_mult, _round_up(block_b, row_mult))
    num_tiles = pl.cdiv(rows, block_b)
    block_b = _round_up(pl.cdiv(rows, num_tiles), row_mult)
    padded_b = block_b * num_tiles
    x_in = x if padded_b == B else jnp.pad(x, ((0, padded_b - B), (0, 0)))

    operands = (x_in,
                weights[0], biases[0],
                weights[1], biases[1],
                weights[2], biases[2],
                weights[3], biases[3])

    out_spec = pl.BlockSpec((block_b, padded_out), lambda i: (i, 0))

    # ---- Cost estimate (helps XLA scheduling around the custom call) ----
    dims = [L, weights[0].shape[1], weights[1].shape[1], weights[2].shape[1],
            out_dim]
    flops = 2 * padded_b * sum(dims[k] * dims[k + 1] for k in range(4))
    bytes_accessed = (x_in.size * x_in.dtype.itemsize
                      + sum(w.size * w.dtype.itemsize for w in weights)
                      + sum(b.size * b.dtype.itemsize for b in biases)
                      + padded_b * padded_out * x.dtype.itemsize)
    cost = pl.CostEstimate(flops=flops, transcendentals=0,
                           bytes_accessed=bytes_accessed)

    # ---- Explicit VMEM budget from actual tile sizes ----
    # (v7x: 64 MiB physical / 32 MiB scoped default; v5e: 16 MiB default.)
    w_bytes = (sum(w.size * w.dtype.itemsize for w in weights)
               + sum(b.size * b.dtype.itemsize for b in biases))
    act_bytes = block_b * (2 * L + 4 * L + 8 * L) * 4 * 2  # f32 + cast copies
    tile_bytes = (2 * block_b * L * 4            # x tile (double-buffered)
                  + 2 * block_b * padded_out * 4  # out tile (double-buffered)
                  + 2 * w_bytes                   # weights (worst case 2x)
                  + act_bytes)
    vmem_limit = int(min(60 * 2 ** 20, max(32 * 2 ** 20, 2 * tile_bytes)))

    # TODO(synk): if latent_dim is ever scaled so resident weights approach
    # v7x's 64 MiB VMEM, add an N-tiling grid axis over w3/w4's output
    # features (e.g. 512-wide blocks).

    def _run(single_buffer_weights):
        # Weights/biases never change across grid steps: constant index_map
        # keeps them VMEM-resident; Buffered(1) drops the useless 2nd buffer.
        const_kwargs = ({"pipeline_mode": pl.Buffered(1)}
                        if single_buffer_weights else {})
        in_specs = [pl.BlockSpec((block_b, L), lambda i: (i, 0))]
        for w, b in zip(weights, biases):
            in_specs.append(pl.BlockSpec(w.shape, lambda i: (0, 0),
                                         **const_kwargs))
            in_specs.append(pl.BlockSpec(b.shape, lambda i: (0, 0),
                                         **const_kwargs))
        return pl.pallas_call(
            _decoder_kernel,
            out_shape=jax.ShapeDtypeStruct((padded_b, padded_out), x.dtype),
            grid=(num_tiles,),
            in_specs=in_specs,
            out_specs=out_spec,
            compiler_params=pltpu.CompilerParams(
                dimension_semantics=("parallel",),
                vmem_limit_bytes=vmem_limit),
            cost_estimate=cost,
        )(*operands)

    try:
        out_padded = _run(True)
    except Exception:
        # Fallback: if single-buffering via pipeline_mode is unsupported by
        # this toolchain, default double-buffering is still correct (and the
        # extra VMEM is trivial at these sizes).
        out_padded = _run(False)

    if not slice_output:
        return out_padded  # (padded_b, padded_out) lane-dense slab
    return out_padded[:B, :out_dim]


def init_decoder_params(key, latent_dim, input_dim):
    """Deterministic synthetic init; shapes match nn.Linear in the module."""
    dims = [latent_dim, latent_dim * 2, latent_dim * 4, latent_dim * 8, input_dim]
    params = {}
    keys = jax.random.split(key, 8)
    for i in range(4):
        fan_in, fan_out = dims[i], dims[i + 1]
        bound = 1.0 / jnp.sqrt(fan_in)
        # stored as (in, out); torch stores (out, in) — transposed on purpose.
        params[f"w{i + 1}"] = jax.random.uniform(
            keys[2 * i], (fan_in, fan_out), jnp.float32, -bound, bound)
        params[f"b{i + 1}"] = jax.random.uniform(
            keys[2 * i + 1], (1, fan_out), jnp.float32, -bound, bound)
    return params


def decoder_ref(x, params):
    """Pure-JAX reference for correctness checking."""
    h = jnp.maximum(x @ params["w1"] + params["b1"], 0.0)
    h = jnp.maximum(h @ params["w2"] + params["b2"], 0.0)
    h = jnp.maximum(h @ params["w3"] + params["b3"], 0.0)
    return h @ params["w4"] + params["b4"]


if __name__ == "__main__":
    LATENT_DIM = 32   # config.latent_dim
    INPUT_DIM = 64    # config.input_dim (reconstruction target dim)
    BATCH = 8

    key = jax.random.PRNGKey(0)
    kx, kp = jax.random.split(key)

    x = jax.random.normal(kx, (BATCH, LATENT_DIM), jnp.float32)
    params = init_decoder_params(kp, LATENT_DIM, INPUT_DIM)

    ref = decoder_ref(x, params)

    # f32 MXU operand path: must match the reference tightly.
    prepared_f32 = prepare_decoder_params(params, use_bf16=False)
    out = decoder_forward(x, prepared_f32)
    out = jax.block_until_ready(out)
    assert out.shape == (BATCH, INPUT_DIM), out.shape
    assert jnp.allclose(out, ref, atol=1e-5, rtol=1e-5), \
        float(jnp.max(jnp.abs(out - ref)))

    # Default fast path: bf16 MXU operands (f32 accumulate), looser tolerance.
    prepared_bf16 = prepare_decoder_params(params)  # use_bf16=True default
    out_bf16 = decoder_forward(x, prepared_bf16)
    out_bf16 = jax.block_until_ready(out_bf16)
    assert out_bf16.shape == (BATCH, INPUT_DIM), out_bf16.shape
    assert jnp.allclose(out_bf16, ref, atol=2e-1, rtol=5e-2), \
        float(jnp.max(jnp.abs(out_bf16 - ref)))

    print("KERNEL_OK")
</pallas_src>

<mosaic_0001>
module attributes {stable_mosaic.version = 11 : i64} {
  func.func @_decoder_kernel(%arg0: i32, %arg1: memref<8x32xf32, #tpu.memory_space<vmem>>, %arg2: memref<32x64xf32, #tpu.memory_space<vmem>>, %arg3: memref<1x64xf32, #tpu.memory_space<vmem>>, %arg4: memref<64x128xf32, #tpu.memory_space<vmem>>, %arg5: memref<1x128xf32, #tpu.memory_space<vmem>>, %arg6: memref<128x256xf32, #tpu.memory_space<vmem>>, %arg7: memref<1x256xf32, #tpu.memory_space<vmem>>, %arg8: memref<256x128xf32, #tpu.memory_space<vmem>>, %arg9: memref<1x128xf32, #tpu.memory_space<vmem>>, %arg10: memref<8x128xf32, #tpu.memory_space<vmem>>) attributes {dimension_semantics = [#tpu.dimension_semantics<parallel>], iteration_bounds = array<i64: 1>, scalar_prefetch = 0 : i64, scratch_operands = 0 : i64, tpu.core_type = #tpu.core_type<tc>, window_params = [{transform_indices = @transform_0, window_bounds = array<i64: 8, 32>}, {pipeline_mode = #tpu.pipeline_mode<synchronous>, transform_indices = @transform_1, window_bounds = array<i64: 32, 64>}, {pipeline_mode = #tpu.pipeline_mode<synchronous>, transform_indices = @transform_2, window_bounds = array<i64: 1, 64>}, {pipeline_mode = #tpu.pipeline_mode<synchronous>, transform_indices = @transform_3, window_bounds = array<i64: 64, 128>}, {pipeline_mode = #tpu.pipeline_mode<synchronous>, transform_indices = @transform_4, window_bounds = array<i64: 1, 128>}, {pipeline_mode = #tpu.pipeline_mode<synchronous>, transform_indices = @transform_5, window_bounds = array<i64: 128, 256>}, {pipeline_mode = #tpu.pipeline_mode<synchronous>, transform_indices = @transform_6, window_bounds = array<i64: 1, 256>}, {pipeline_mode = #tpu.pipeline_mode<synchronous>, transform_indices = @transform_7, window_bounds = array<i64: 256, 128>}, {pipeline_mode = #tpu.pipeline_mode<synchronous>, transform_indices = @transform_8, window_bounds = array<i64: 1, 128>}, {transform_indices = @transform_9, window_bounds = array<i64: 8, 128>}]} {
    %c0 = arith.constant 0 : index
    %c0_0 = arith.constant 0 : index
    %0 = vector.load %arg1[%c0, %c0_0] : memref<8x32xf32, #tpu.memory_space<vmem>>, vector<8x32xf32>
    %c0_1 = arith.constant 0 : index
    %c0_2 = arith.constant 0 : index
    %1 = vector.load %arg2[%c0_1, %c0_2] : memref<32x64xf32, #tpu.memory_space<vmem>>, vector<32x64xf32>
    %cst = arith.constant dense<0.000000e+00> : vector<8x64xf32>
    %2 = tpu.matmul %0, %1, %cst {dimension_numbers = #tpu.dot_dimension_numbers<[1], [0], [0], [1], [0, 0, 1, 1], [], []>} : vector<8x32xf32>, vector<32x64xf32>, vector<8x64xf32> -> vector<8x64xf32>
    %c0_3 = arith.constant 0 : index
    %c0_4 = arith.constant 0 : index
    %3 = vector.load %arg3[%c0_3, %c0_4] : memref<1x64xf32, #tpu.memory_space<vmem>>, vector<1x64xf32>
    %4 = vector.broadcast %3 : vector<1x64xf32> to vector<8x64xf32>
    %5 = arith.addf %2, %4 : vector<8x64xf32>
    %cst_5 = arith.constant 0.000000e+00 : f32
    %6 = vector.broadcast %cst_5 : f32 to vector<8x64xf32>
    %7 = arith.maximumf %5, %6 : vector<8x64xf32>
    %c0_6 = arith.constant 0 : index
    %c0_7 = arith.constant 0 : index
    %8 = vector.load %arg4[%c0_6, %c0_7] : memref<64x128xf32, #tpu.memory_space<vmem>>, vector<64x128xf32>
    %cst_8 = arith.constant dense<0.000000e+00> : vector<8x128xf32>
    %9 = tpu.matmul %7, %8, %cst_8 {dimension_numbers = #tpu.dot_dimension_numbers<[1], [0], [0], [1], [0, 0, 1, 1], [], []>} : vector<8x64xf32>, vector<64x128xf32>, vector<8x128xf32> -> vector<8x128xf32>
    %c0_9 = arith.constant 0 : index
    %c0_10 = arith.constant 0 : index
    %10 = vector.load %arg5[%c0_9, %c0_10] : memref<1x128xf32, #tpu.memory_space<vmem>>, vector<1x128xf32>
    %11 = vector.broadcast %10 : vector<1x128xf32> to vector<8x128xf32>
    %12 = arith.addf %9, %11 : vector<8x128xf32>
    %cst_11 = arith.constant 0.000000e+00 : f32
    %13 = vector.broadcast %cst_11 : f32 to vector<8x128xf32>
    %14 = arith.maximumf %12, %13 : vector<8x128xf32>
    %c0_12 = arith.constant 0 : index
    %c0_13 = arith.constant 0 : index
    %15 = vector.load %arg6[%c0_12, %c0_13] : memref<128x256xf32, #tpu.memory_space<vmem>>, vector<128x256xf32>
    %cst_14 = arith.constant dense<0.000000e+00> : vector<8x256xf32>
    %16 = tpu.matmul %14, %15, %cst_14 {dimension_numbers = #tpu.dot_dimension_numbers<[1], [0], [0], [1], [0, 0, 1, 1], [], []>} : vector<8x128xf32>, vector<128x256xf32>, vector<8x256xf32> -> vector<8x256xf32>
    %c0_15 = arith.constant 0 : index
    %c0_16 = arith.constant 0 : index
    %17 = vector.load %arg7[%c0_15, %c0_16] : memref<1x256xf32, #tpu.memory_space<vmem>>, vector<1x256xf32>
    %18 = vector.broadcast %17 : vector<1x256xf32> to vector<8x256xf32>
    %19 = arith.addf %16, %18 : vector<8x256xf32>
    %cst_17 = arith.constant 0.000000e+00 : f32
    %20 = vector.broadcast %cst_17 : f32 to vector<8x256xf32>
    %21 = arith.maximumf %19, %20 : vector<8x256xf32>
    %c0_18 = arith.constant 0 : index
    %c0_19 = arith.constant 0 : index
    %22 = vector.load %arg8[%c0_18, %c0_19] : memref<256x128xf32, #tpu.memory_space<vmem>>, vector<256x128xf32>
    %cst_20 = arith.constant dense<0.000000e+00> : vector<8x128xf32>
    %23 = tpu.matmul %21, %22, %cst_20 {dimension_numbers = #tpu.dot_dimension_numbers<[1], [0], [0], [1], [0, 0, 1, 1], [], []>} : vector<8x256xf32>, vector<256x128xf32>, vector<8x128xf32> -> vector<8x128xf32>
    %c0_21 = arith.constant 0 : index
    %c0_22 = arith.constant 0 : index
    %24 = vector.load %arg9[%c0_21, %c0_22] : memref<1x128xf32, #tpu.memory_space<vmem>>, vector<1x128xf32>
    %25 = vector.broadcast %24 : vector<1x128xf32> to vector<8x128xf32>
    %26 = arith.addf %23, %25 : vector<8x128xf32>
    %c0_23 = arith.constant 0 : index
    %c0_24 = arith.constant 0 : index
    %27 = vector.load %arg10[%c0_23, %c0_24] : memref<8x128xf32, #tpu.memory_space<vmem>>, vector<8x128xf32>
    tpu.vector_store %arg10[%c0_23, %c0_24], %26 {strides = array<i32>} : memref<8x128xf32, #tpu.memory_space<vmem>>, vector<8x128xf32>,
    return
  }
  func.func @transform_0(%arg0: i32) -> (i32, i32) {
    %c0_i32 = arith.constant 0 : i32
    %c0_i32_0 = arith.constant 0 : i32
    return %arg0, %c0_i32 : i32, i32
  }
  func.func @transform_1(%arg0: i32) -> (i32, i32) {
    %c0_i32 = arith.constant 0 : i32
    %c0_i32_0 = arith.constant 0 : i32
    %c0_i32_1 = arith.constant 0 : i32
    return %c0_i32, %c0_i32_0 : i32, i32
  }
  func.func @transform_2(%arg0: i32) -> (i32, i32) {
    %c0_i32 = arith.constant 0 : i32
    %c0_i32_0 = arith.constant 0 : i32
    %c0_i32_1 = arith.constant 0 : i32
    return %c0_i32, %c0_i32_0 : i32, i32
  }
  func.func @transform_3(%arg0: i32) -> (i32, i32) {
    %c0_i32 = arith.constant 0 : i32
    %c0_i32_0 = arith.constant 0 : i32
    %c0_i32_1 = arith.constant 0 : i32
    return %c0_i32, %c0_i32_0 : i32, i32
  }
  func.func @transform_4(%arg0: i32) -> (i32, i32) {
    %c0_i32 = arith.constant 0 : i32
    %c0_i32_0 = arith.constant 0 : i32
    %c0_i32_1 = arith.constant 0 : i32
    return %c0_i32, %c0_i32_0 : i32, i32
  }
  func.func @transform_5(%arg0: i32) -> (i32, i32) {
    %c0_i32 = arith.constant 0 : i32
    %c0_i32_0 = arith.constant 0 : i32
    %c0_i32_1 = arith.constant 0 : i32
    return %c0_i32, %c0_i32_0 : i32, i32
  }
  func.func @transform_6(%arg0: i32) -> (i32, i32) {
    %c0_i32 = arith.constant 0 : i32
    %c0_i32_0 = arith.constant 0 : i32
    %c0_i32_1 = arith.constant 0 : i32
    return %c0_i32, %c0_i32_0 : i32, i32
  }
  func.func @transform_7(%arg0: i32) -> (i32, i32) {
    %c0_i32 = arith.constant 0 : i32
    %c0_i32_0 = arith.constant 0 : i32
    %c0_i32_1 = arith.constant 0 : i32
    return %c0_i32, %c0_i32_0 : i32, i32
  }
  func.func @transform_8(%arg0: i32) -> (i32, i32) {
    %c0_i32 = arith.constant 0 : i32
    %c0_i32_0 = arith.constant 0 : i32
    %c0_i32_1 = arith.constant 0 : i32
    return %c0_i32, %c0_i32_0 : i32, i32
  }
  func.func @transform_9(%arg0: i32) -> (i32, i32) {
    %c0_i32 = arith.constant 0 : i32
    %c0_i32_0 = arith.constant 0 : i32
    return %arg0, %c0_i32 : i32, i32
  }
}

module attributes {stable_mosaic.version = 11 : i64} {
  func.func @_decoder_kernel(%arg0: i32, %arg1: memref<8x32xf32, #tpu.memory_space<vmem>>, %arg2: memref<32x64xf32, #tpu.memory_space<vmem>>, %arg3: memref<1x64xf32, #tpu.memory_space<vmem>>, %arg4: memref<64x128xf32, #tpu.memory_space<vmem>>, %arg5: memref<1x128xf32, #tpu.memory_space<vmem>>, %arg6: memref<128x256xf32, #tpu.memory_space<vmem>>, %arg7: memref<1x256xf32, #tpu.memory_space<vmem>>, %arg8: memref<256x128xf32, #tpu.memory_space<vmem>>, %arg9: memref<1x128xf32, #tpu.memory_space<vmem>>, %arg10: memref<8x128xf32, #tpu.memory_space<vmem>>) attributes {dimension_semantics = [#tpu.dimension_semantics<parallel>], iteration_bounds = array<i64: 1>, scalar_prefetch = 0 : i64, scratch_operands = 0 : i64, tpu.core_type = #tpu.core_type<tc>, window_params = [{transform_indices = @transform_0, window_bounds = array<i64: 8, 32>}, {pipeline_mode = #tpu.pipeline_mode<synchronous>, transform_indices = @transform_1, window_bounds = array<i64: 32, 64>}, {pipeline_mode = #tpu.pipeline_mode<synchronous>, transform_indices = @transform_2, window_bounds = array<i64: 1, 64>}, {pipeline_mode = #tpu.pipeline_mode<synchronous>, transform_indices = @transform_3, window_bounds = array<i64: 64, 128>}, {pipeline_mode = #tpu.pipeline_mode<synchronous>, transform_indices = @transform_4, window_bounds = array<i64: 1, 128>}, {pipeline_mode = #tpu.pipeline_mode<synchronous>, transform_indices = @transform_5, window_bounds = array<i64: 128, 256>}, {pipeline_mode = #tpu.pipeline_mode<synchronous>, transform_indices = @transform_6, window_bounds = array<i64: 1, 256>}, {pipeline_mode = #tpu.pipeline_mode<synchronous>, transform_indices = @transform_7, window_bounds = array<i64: 256, 128>}, {pipeline_mode = #tpu.pipeline_mode<synchronous>, transform_indices = @transform_8, window_bounds = array<i64: 1, 128>}, {transform_indices = @transform_9, window_bounds = array<i64: 8, 128>}]} {
    %c0 = arith.constant 0 : index
    %c0_0 = arith.constant 0 : index
    %0 = vector.load %arg1[%c0, %c0_0] : memref<8x32xf32, #tpu.memory_space<vmem>>, vector<8x32xf32>
    %c0_1 = arith.constant 0 : index
    %c0_2 = arith.constant 0 : index
    %1 = vector.load %arg2[%c0_1, %c0_2] : memref<32x64xf32, #tpu.memory_space<vmem>>, vector<32x64xf32>
    %cst = arith.constant dense<0.000000e+00> : vector<8x64xf32>
    %2 = tpu.matmul %0, %1, %cst {dimension_numbers = #tpu.dot_dimension_numbers<[1], [0], [0], [1], [0, 0, 1, 1], [], []>} : vector<8x32xf32>, vector<32x64xf32>, vector<8x64xf32> -> vector<8x64xf32>
    %c0_3 = arith.constant 0 : index
    %c0_4 = arith.constant 0 : index
    %3 = vector.load %arg3[%c0_3, %c0_4] : memref<1x64xf32, #tpu.memory_space<vmem>>, vector<1x64xf32>
    %4 = vector.broadcast %3 : vector<1x64xf32> to vector<8x64xf32>
    %5 = arith.addf %2, %4 : vector<8x64xf32>
    %cst_5 = arith.constant 0.000000e+00 : f32
    %6 = vector.broadcast %cst_5 : f32 to vector<8x64xf32>
    %7 = arith.maximumf %5, %6 : vector<8x64xf32>
    %c0_6 = arith.constant 0 : index
    %c0_7 = arith.constant 0 : index
    %8 = vector.load %arg4[%c0_6, %c0_7] : memref<64x128xf32, #tpu.memory_space<vmem>>, vector<64x128xf32>
    %cst_8 = arith.constant dense<0.000000e+00> : vector<8x128xf32>
    %9 = tpu.matmul %7, %8, %cst_8 {dimension_numbers = #tpu.dot_dimension_numbers<[1], [0], [0], [1], [0, 0, 1, 1], [], []>} : vector<8x64xf32>, vector<64x128xf32>, vector<8x128xf32> -> vector<8x128xf32>
    %c0_9 = arith.constant 0 : index
    %c0_10 = arith.constant 0 : index
    %10 = vector.load %arg5[%c0_9, %c0_10] : memref<1x128xf32, #tpu.memory_space<vmem>>, vector<1x128xf32>
    %11 = vector.broadcast %10 : vector<1x128xf32> to vector<8x128xf32>
    %12 = arith.addf %9, %11 : vector<8x128xf32>
    %cst_11 = arith.constant 0.000000e+00 : f32
    %13 = vector.broadcast %cst_11 : f32 to vector<8x128xf32>
    %14 = arith.maximumf %12, %13 : vector<8x128xf32>
    %c0_12 = arith.constant 0 : index
    %c0_13 = arith.constant 0 : index
    %15 = vector.load %arg6[%c0_12, %c0_13] : memref<128x256xf32, #tpu.memory_space<vmem>>, vector<128x256xf32>
    %cst_14 = arith.constant dense<0.000000e+00> : vector<8x256xf32>
    %16 = tpu.matmul %14, %15, %cst_14 {dimension_numbers = #tpu.dot_dimension_numbers<[1], [0], [0], [1], [0, 0, 1, 1], [], []>} : vector<8x128xf32>, vector<128x256xf32>, vector<8x256xf32> -> vector<8x256xf32>
    %c0_15 = arith.constant 0 : index
    %c0_16 = arith.constant 0 : index
    %17 = vector.load %arg7[%c0_15, %c0_16] : memref<1x256xf32, #tpu.memory_space<vmem>>, vector<1x256xf32>
    %18 = vector.broadcast %17 : vector<1x256xf32> to vector<8x256xf32>
    %19 = arith.addf %16, %18 : vector<8x256xf32>
    %cst_17 = arith.constant 0.000000e+00 : f32
    %20 = vector.broadcast %cst_17 : f32 to vector<8x256xf32>
    %21 = arith.maximumf %19, %20 : vector<8x256xf32>
    %c0_18 = arith.constant 0 : index
    %c0_19 = arith.constant 0 : index
    %22 = vector.load %arg8[%c0_18, %c0_19] : memref<256x128xf32, #tpu.memory_space<vmem>>, vector<256x128xf32>
    %cst_20 = arith.constant dense<0.000000e+00> : vector<8x128xf32>
    %23 = tpu.matmul %21, %22, %cst_20 {dimension_numbers = #tpu.dot_dimension_numbers<[1], [0], [0], [1], [0, 0, 1, 1], [], []>} : vector<8x256xf32>, vector<256x128xf32>, vector<8x128xf32> -> vector<8x128xf32>
    %c0_21 = arith.constant 0 : index
    %c0_22 = arith.constant 0 : index
    %24 = vector.load %arg9[%c0_21, %c0_22] : memref<1x128xf32, #tpu.memory_space<vmem>>, vector<1x128xf32>
    %25 = vector.broadcast %24 : vector<1x128xf32> to vector<8x128xf32>
    %26 = arith.addf %23, %25 : vector<8x128xf32>
    %c0_23 = arith.constant 0 : index
    %c0_24 = arith.constant 0 : index
    %27 = vector.load %arg10[%c0_23, %c0_24] : memref<8x128xf32, #tpu.memory_space<vmem>>, vector<8x128xf32>
    tpu.vector_store %arg10[%c0_23, %c0_24], %26 {strides = array<i32>} : memref<8x128xf32, #tpu.memory_space<vmem>>, vector<8x128xf32>,
    return
  }
  func.func @transform_0(%arg0: i32) -> (i32, i32) {
    %c0_i32 = arith.constant 0 : i32
    %c0_i32_0 = arith.constant 0 : i32
    return %arg0, %c0_i32 : i32, i32
  }
  func.func @transform_1(%arg0: i32) -> (i32, i32) {
    %c0_i32 = arith.constant 0 : i32
    %c0_i32_0 = arith.constant 0 : i32
    %c0_i32_1 = arith.constant 0 : i32
    return %c0_i32, %c0_i32_0 : i32, i32
  }
  func.func @transform_2(%arg0: i32) -> (i32, i32) {
    %c0_i32 = arith.constant 0 : i32
    %c0_i32_0 = arith.constant 0 : i32
    %c0_i32_1 = arith.constant 0 : i32
    return %c0_i32, %c0_i32_0 : i32, i32
  }
  func.func @transform_3(%arg0: i32) -> (i32, i32) {
    %c0_i32 = arith.constant 0 : i32
    %c0_i32_0 = arith.constant 0 : i32
    %c0_i32_1 = arith.constant 0 : i32
    return %c0_i32, %c0_i32_0 : i32, i32
  }
  func.func @transform_4(%arg0: i32) -> (i32, i32) {
    %c0_i32 = arith.constant 0 : i32
    %c0_i32_0 = arith.constant 0 : i32
    %c0_i32_1 = arith.constant 0 : i32
    return %c0_i32, %c0_i32_0 : i32, i32
  }
  func.func @transform_5(%arg0: i32) -> (i32, i32) {
    %c0_i32 = arith.constant 0 : i32
    %c0_i32_0 = arith.constant 0 : i32
    %c0_i32_1 = arith.constant 0 : i32
    return %c0_i32, %c0_i32_0 : i32, i32
  }
  func.func @transform_6(%arg0: i32) -> (i32, i32) {
    %c0_i32 = arith.constant 0 : i32
    %c0_i32_0 = arith.constant 0 : i32
    %c0_i32_1 = arith.constant 0 : i32
    return %c0_i32, %c0_i32_0 : i32, i32
  }
  func.func @transform_7(%arg0: i32) -> (i32, i32) {
    %c0_i32 = arith.constant 0 : i32
    %c0_i32_0 = arith.constant 0 : i32
    %c0_i32_1 = arith.constant 0 : i32
    return %c0_i32, %c0_i32_0 : i32, i32
  }
  func.func @transform_8(%arg0: i32) -> (i32, i32) {
    %c0_i32 = arith.constant 0 : i32
    %c0_i32_0 = arith.constant 0 : i32
    %c0_i32_1 = arith.constant 0 : i32
    return %c0_i32, %c0_i32_0 : i32, i32
  }
  func.func @transform_9(%arg0: i32) -> (i32, i32) {
    %c0_i32 = arith.constant 0 : i32
    %c0_i32_0 = arith.constant 0 : i32
    return %arg0, %c0_i32 : i32, i32
  }
}

</mosaic_0001>

<bundles_post_ra>
// kernel: tpu_custom_call.1
= control target key start
LH: loop header
LB: loop body
LE: loop exit
PB: predicated region body
PF: predicated region fallthrough
CT: control target
= control target key end

     0   :  { %14 = vsyncpa [#allocation3], 0  ;;  %s1002_s0 = inlined_call_operand.hbm [shape: f32[8,32], index: 0, kind: input, shape index: {}]   ;;  %s1003_s1 = inlined_call_operand.hbm [shape: f32[32,64], index: 1, kind: input, shape index: {}]   ;;  %s1004_s2 = inlined_call_operand.vmem [shape: f32[1,64], index: 2, kind: input, shape index: {}]   ;;  %s1005_s3 = inlined_call_operand.hbm [shape: f32[64,128], index: 3, kind: input, shape index: {}]   ;;  %s1006_s4 = inlined_call_operand.vmem [shape: f32[1,128], index: 4, kind: input, shape index: {}]   ;;  %s1007_s5 = inlined_call_operand.hbm [shape: f32[128,256], index: 5, kind: input, shape index: {}]   ;;  %s1008_s6 = inlined_call_operand.vmem [shape: f32[1,256], index: 6, kind: input, shape index: {}]   ;;  %s1009_s7 = inlined_call_operand.hbm [shape: f32[256,128], index: 7, kind: input, shape index: {}]   ;;  %s1010_s8 = inlined_call_operand.vmem [shape: f32[1,128], index: 8, kind: input, shape index: {}]   ;;  %s1011_s9 = inlined_call_operand.hbm [shape: f32[8,128], index: 9, kind: output, shape index: {}]  }
   0x1   :  { %15 = vsyncpa [#allocation6], 0 }
   0x2   :  { %16 = vsyncpa [#allocation9], 0 }
   0x3   :  { %17 = vsyncpa [#allocation4], 0  ;;  %s839_s30 = smov [#allocation5]   ;;  %s699_s13 = scalar_lea.hbm %s1003_s1, 512 }
   0x4   :  { %s33_s10 = sshll.u32 %s839_s30, 4  ;;  %p700_p0 = scmp.ne.s32.totalorder %s1003_s1, %s699_s13  ;;  %s34_s10 = int_to_ptr.vmem [resolvable:$true] %s33_s10 }
   0x5   :  { %p703_p1 = scmp.lt.u32.totalorder %s699_s13, %s1003_s1 }
   0x7   :  { %p705_p2 = pnand %p703_p1, %p700_p0 }
   0x9   :  { %708 = shalt.err (!%p705_p2)
}
   0xa   :  { %s709_s18 = scalar_lea.vmem %s34_s10, 512  ;;  %p714_p4 = scmp.lt.s32.totalorder %s34_s10, %s34_s10 }
   0xb   :  { %p710_p3 = scmp.ne.s32.totalorder %s34_s10, %s709_s18  ;;  %p715_p5 = scmp.lt.s32.totalorder %s709_s18, %s709_s18 }
   0xd   :  { %p716_p6 = por %p715_p5, %p714_p4 }
   0xf   :  { %p717_p7 = pnand %p716_p6, %p710_p3 }
  0x11   :  { %720 = shalt.err (!%p717_p7)
}
  0x12   :  { %s840_s19 = smov 128   ;;  %s841_s20 = smov 8  }
  0x13   :  { %39 = dma.hbm_to_vmem [thread:$0]  %s1003_s1, 512, %s34_s10, [#allocation6], %s840_s19, %s840_s19, %s841_s20  }
  0x14   :  { %s842_s23 = smov [#allocation8]   ;;  %s721_s27 = scalar_lea.hbm %s1007_s5, 4096 }
  0x15   :  { %s61_s24 = sshll.u32 %s842_s23, 4  ;;  %p722_p8 = scmp.ne.s32.totalorder %s1007_s5, %s721_s27  ;;  %s62_s24 = int_to_ptr.vmem [resolvable:$true] %s61_s24 }
  0x16   :  { %p725_p9 = scmp.lt.u32.totalorder %s721_s27, %s1007_s5 }
  0x18   :  { %p727_p10 = pnand %p725_p9, %p722_p8 }
  0x1a   :  { %730 = shalt.err (!%p727_p10)
}
  0x1b   :  { %s731_s12 = scalar_lea.vmem %s62_s24, 4096  ;;  %p736_p12 = scmp.lt.s32.totalorder %s62_s24, %s62_s24 }
  0x1c   :  { %p732_p11 = scmp.ne.s32.totalorder %s62_s24, %s731_s12  ;;  %p737_p13 = scmp.lt.s32.totalorder %s731_s12, %s731_s12 }
  0x1e   :  { %p738_p0 = por %p737_p13, %p736_p12 }
  0x20   :  { %p739_p1 = pnand %p738_p0, %p732_p11 }
  0x22   :  { %742 = shalt.err (!%p739_p1)
}
  0x23   :  { %s843_s1 = smov 256   ;;  %s844_s10 = smov 16  }
  0x24   :  { %67 = dma.hbm_to_vmem [thread:$0]  %s1007_s5, 4096, %s62_s24, [#allocation9], %s843_s1, %s843_s1, %s844_s10  }
  0x25   :  { %s845_s15 = smov [#allocation2]   ;;  %s846_s17 = smov [#allocation7]  }
  0x26   :  { %s24_s16 = sshll.u32 %s845_s15, 4  ;;  %s47_s18 = sshll.u32 %s846_s17, 4  ;;  %s25_s16 = int_to_ptr.vmem [resolvable:$true] %s24_s16  ;;  %s929_s18 = int_to_ptr.vmem [resolvable:$true] %s47_s18 }
  0x27   :  { %s743_s23 = scalar_lea.hbm %s1002_s0, 128 }
  0x28   :  { %p744_p2 = scmp.ne.s32.totalorder %s1002_s0, %s743_s23  ;;  %p747_p3 = scmp.lt.u32.totalorder %s743_s23, %s1002_s0 }
  0x2a   :  { %p749_p4 = pnand %p747_p3, %p744_p2 }
  0x2c   :  { %752 = shalt.err (!%p749_p4)
}
  0x2d   :  { %s753_s5 = scalar_lea.vmem %s25_s16, 128  ;;  %p758_p6 = scmp.lt.s32.totalorder %s25_s16, %s25_s16 }
  0x2e   :  { %p754_p5 = scmp.ne.s32.totalorder %s25_s16, %s753_s5  ;;  %p759_p7 = scmp.lt.s32.totalorder %s753_s5, %s753_s5 }
  0x30   :  { %p760_p8 = por %p759_p7, %p758_p6 }
  0x32   :  { %p761_p9 = pnand %p760_p8, %p754_p5 }
  0x34   :  { %764 = shalt.err (!%p761_p9)
}
  0x35   :  { %27 = dma.hbm_to_vmem [thread:$0]  %s1002_s0, 128, %s25_s16, [#allocation3]  }
  0x36   :  { %s765_s12 = scalar_lea.hbm %s1005_s3, 1024 }
  0x37   :  { %p766_p10 = scmp.ne.s32.totalorder %s1005_s3, %s765_s12  ;;  %p769_p11 = scmp.lt.u32.totalorder %s765_s12, %s1005_s3 }
  0x39   :  { %p771_p12 = pnand %p769_p11, %p766_p10 }
  0x3b   :  { %774 = shalt.err (!%p771_p12)
}
  0x3c   :  { %s775_s15 = scalar_lea.vmem %s929_s18, 1024  ;;  %p780_p0 = scmp.lt.s32.totalorder %s929_s18, %s929_s18 }
  0x3d   :  { %p776_p13 = scmp.ne.s32.totalorder %s929_s18, %s775_s15  ;;  %p781_p1 = scmp.lt.s32.totalorder %s775_s15, %s775_s15 }
  0x3f   :  { %p782_p2 = por %p781_p1, %p780_p0 }
  0x41   :  { %p783_p3 = pnand %p782_p2, %p776_p13 }
  0x43   :  { %786 = shalt.err (!%p783_p3)
}
  0x44   :  { %53 = dma.hbm_to_vmem [thread:$0]  %s1005_s3, 1024, %s929_s18, [#allocation6], %s840_s19, %s840_s19, %s841_s20  }
  0x45   :  { %s847_s17 = smov [#allocation10]   ;;  %s787_s25 = scalar_lea.hbm %s1009_s7, 4096 }
  0x46   :  { %s75_s21 = sshll.u32 %s847_s17, 4  ;;  %p788_p4 = scmp.ne.s32.totalorder %s1009_s7, %s787_s25  ;;  %s76_s21 = int_to_ptr.vmem [resolvable:$true] %s75_s21 }
  0x47   :  { %p791_p5 = scmp.lt.u32.totalorder %s787_s25, %s1009_s7 }
  0x49   :  { %p793_p6 = pnand %p791_p5, %p788_p4 }
  0x4b   :  { %796 = shalt.err (!%p793_p6)
}
  0x4c   :  { %s797_s24 = scalar_lea.vmem %s76_s21, 4096  ;;  %p802_p8 = scmp.lt.s32.totalorder %s76_s21, %s76_s21 }
  0x4d   :  { %p798_p7 = scmp.ne.s32.totalorder %s76_s21, %s797_s24  ;;  %p803_p9 = scmp.lt.s32.totalorder %s797_s24, %s797_s24 }
  0x4f   :  { %p804_p10 = por %p803_p9, %p802_p8 }
  0x51   :  { %p805_p11 = pnand %p804_p10, %p798_p7 }
  0x53   :  { %808 = shalt.err (!%p805_p11)
}
  0x54   :  { %81 = dma.hbm_to_vmem [thread:$0]  %s1009_s7, 4096, %s76_s21, [#allocation9], %s840_s19, %s840_s19, %s841_s20  }
  0x55   :  { %831 = dma.done.wait [#allocation3], 128  }
  0x56   :  { %832 = vsyncadd [#allocation3], 4294967168 }
  0x57   :  { %833 = dma.done.wait [#allocation6], 1536  }
  0x58   :  { %834 = vsyncadd [#allocation6], 4294965760 }
  0x59   :  { %835 = dma.done.wait [#allocation9], 8192  }
  0x5a   :  { %836 = vsyncadd [#allocation9], 4294959104  ;;  %v848_v0 = vmov 0.0|0.0   ;;  %vm849_vm0 = vmmov 0   ;;  %v850_v1 = vmov 0.0   ;;  %v100_v2 = vld [vmem:[#allocation5] sm:$0xff] }
  0x5b   :  { %604 = vmatprep.subr.bf16.mxu0 %v848_v0  ;;  %582 = vmatprep.mubr.msk.f32.mxu0 %vm849_vm0, %v850_v1  ;;  %v101_v3 = vld [vmem:[#allocation5 + $0x8] sm:$0xff]  ;;  %v102_v4 = vld [vmem:[#allocation5 + $0x10] sm:$0xff]  ;;  %v103_v6 = vld [vmem:[#allocation5 + $0x18] sm:$0xff]  ;;  %vm111_vm1 = vcmask 261120   ;;  %vm201_vm2 = vcmask 523264   ;;  %s851_s12 = smov [#allocation11]  }
  0x5c   :  { %610 = vmatprep.subr.bf16.mxu1 %v848_v0  ;;  %601 = vmatprep.mubr.msk.f32.mxu1 %vm849_vm0, %v850_v1  ;;  %v605_v5 = vpack.c.bf16 %v101_v3, %v100_v2  ;;  %v186_v7 = vld [vmem:[#allocation7] sm:$0xff]  ;;  %v187_v8 = vld [vmem:[#allocation7 + $0x8] sm:$0xff]  ;;  %v188_v9 = vld [vmem:[#allocation7 + $0x10] sm:$0xff]  ;;  %v608_v11 = vpack.c.bf16 %v103_v6, %v102_v4  ;;  %s509_s1 = sshll.u32 %s851_s12, 4  ;;  %s510_s1 = int_to_ptr.vmem [resolvable:$true] %s509_s1 }
  0x5d   :  { %v189_v10 = vld [vmem:[#allocation7 + $0x18] sm:$0xff]  ;;  %v611_v12 = vpack.c.bf16 %v187_v8, %v186_v7  ;;  %v190_v14 = vld [vmem:[#allocation7 + $0x20] sm:$0xff]  ;;  %v191_v15 = vld [vmem:[#allocation7 + $0x28] sm:$0xff]  ;;  %p814_p13 = scmp.lt.s32.totalorder %s510_s1, %s510_s1 }
  0x5e   :  { %606 = vmatpush3.bf16.msra.mxu0 %v605_v5  ;;  %v614_v13 = vpack.c.bf16 %v189_v10, %v188_v9  ;;  %v99_v16 = vld [vmem:[#allocation2] sm:$0xff]  ;;  %v617_v17 = vpack.c.bf16 %v191_v15, %v190_v14  ;;  %v192_v18 = vld [vmem:[#allocation7 + $0x30] sm:$0xff]  ;;  %v277_v21 = vld [vmem:[#allocation8 + $0x8] sm:$0xff] }
  0x5f   :  { %607 = vmatprep.subr.bf16.mxu0 %v848_v0  ;;  %612 = vmatpush3.bf16.msra.mxu1 %v611_v12  ;;  %v193_v19 = vld [vmem:[#allocation7 + $0x38] sm:$0xff]  ;;  %v276_v23 = vld [vmem:[#allocation8] sm:$0xff]  ;;  %v278_v25 = vld [vmem:[#allocation8 + $0x10] sm:$0xff] }
  0x60   :  { %613 = vmatprep.subr.bf16.mxu1 %v848_v0  ;;  %v620_v20 = vpack.c.bf16 %v193_v19, %v192_v18  ;;  %v279_v22 = vld [vmem:[#allocation8 + $0x18] sm:$0xff]  ;;  %v281_v26 = vld [vmem:[#allocation8 + $0x28] sm:$0xff]  ;;  %v624_v28 = vpack.c.bf16 %v278_v25, %v276_v23  ;;  %v280_v30 = vld [vmem:[#allocation8 + $0x20] sm:$0xff] }
  0x61   :  { %v622_v24 = vpack.c.bf16 %v279_v22, %v277_v21  ;;  %v283_v27 = vld [vmem:[#allocation8 + $0x38] sm:$0xff]  ;;  %v282_v31 = vld [vmem:[#allocation8 + $0x30] sm:$0xff]  ;;  %v285_v32 = vld [vmem:[#allocation8 + $0x48] sm:$0xff] }
  0x62   :  { %609 = vmatpush3.bf16.msra.mxu0 %v608_v11  ;;  %v626_v29 = vpack.c.bf16 %v283_v27, %v281_v26  ;;  %v287_v33 = vld [vmem:[#allocation8 + $0x58] sm:$0xff]  ;;  %v628_v34 = vpack.c.bf16 %v282_v31, %v280_v30  ;;  %v284_v36 = vld [vmem:[#allocation8 + $0x40] sm:$0xff]  ;;  %v286_v37 = vld [vmem:[#allocation8 + $0x50] sm:$0xff] }
  0x63   :  { %615 = vmatpush3.bf16.msra.mxu1 %v614_v13  ;;  %623 = vmatprep.subr.bf16.mxu0 %v622_v24  ;;  %v630_v35 = vpack.c.bf16 %v287_v33, %v285_v32  ;;  %v289_v38 = vld [vmem:[#allocation8 + $0x68] sm:$0xff]  ;;  %v291_v39 = vld [vmem:[#allocation8 + $0x78] sm:$0xff]  ;;  %v632_v40 = vpack.c.bf16 %v286_v37, %v284_v36  ;;  %v288_v42 = vld [vmem:[#allocation8 + $0x60] sm:$0xff] }
  0x64   :  { %616 = vmatprep.subr.bf16.mxu1 %v848_v0  ;;  %v634_v41 = vpack.c.bf16 %v291_v39, %v289_v38  ;;  %v290_v43 = vld [vmem:[#allocation8 + $0x70] sm:$0xff]  ;;  %v293_v44 = vld [vmem:[#allocation8 + $0x88] sm:$0xff]  ;;  %v295_v45 = vld [vmem:[#allocation8 + $0x98] sm:$0xff] }
  0x65   :  { %583 = vmatmul.mubr.msk.f32.vlgmr.msra.gmra.mrb[0].mxu0 %vm111_vm1, %v99_v16  ;;  %v636_v46 = vpack.c.bf16 %v290_v43, %v288_v42  ;;  %v638_v47 = vpack.c.bf16 %v295_v45, %v293_v44  ;;  %v292_v48 = vld [vmem:[#allocation8 + $0x80] sm:$0xff]  ;;  %v294_v49 = vld [vmem:[#allocation8 + $0x90] sm:$0xff]  ;;  %v297_v50 = vld [vmem:[#allocation8 + $0xa8] sm:$0xff] }
  0x66   :  { %384 = vmatprep.mubr.f32.mxu0 %v850_v1  ;;  %625 = vmatpush1.bf16.msra.mxu0 %v624_v28  ;;  %v299_v51 = vld [vmem:[#allocation8 + $0xb8] sm:$0xff]  ;;  %v640_v52 = vpack.c.bf16 %v294_v49, %v292_v48  ;;  %v296_v54 = vld [vmem:[#allocation8 + $0xa0] sm:$0xff]  ;;  %v298_v55 = vld [vmem:[#allocation8 + $0xb0] sm:$0xff] }
  0x67   :  { %618 = vmatpush3.bf16.msra.mxu1 %v617_v17  ;;  %627 = vmatprep.subr.bf16.mxu0 %v626_v29  ;;  %v642_v53 = vpack.c.bf16 %v299_v51, %v297_v50  ;;  %v301_v56 = vld [vmem:[#allocation8 + $0xc8] sm:$0xff]  ;;  %v303_v57 = vld [vmem:[#allocation8 + $0xd8] sm:$0xff]  ;;  %v644_v58 = vpack.c.bf16 %v298_v55, %v296_v54  ;;  %v300_v60 = vld [vmem:[#allocation8 + $0xc0] sm:$0xff] }
  0x68   :  { %619 = vmatprep.subr.bf16.mxu1 %v848_v0  ;;  %v646_v59 = vpack.c.bf16 %v303_v57, %v301_v56  ;;  %v302_v61 = vld [vmem:[#allocation8 + $0xd0] sm:$0xff]  ;;  %v520_v63 = vld [vmem:[%s1004_s2] ss:$0 sm:$0xff]  ;;  %v305_v4 = vld [vmem:[#allocation8 + $0xe8] sm:$0xff] }
  0x69   :  { %v648_v62 = vpack.c.bf16 %v302_v61, %v300_v60  ;;  %v307_v5 = vld [vmem:[#allocation8 + $0xf8] sm:$0xff]  ;;  %v304_v7 = vld [vmem:[#allocation8 + $0xe0] sm:$0xff]  ;;  %v306_v8 = vld [vmem:[#allocation8 + $0xf0] sm:$0xff] }
  0x6a   :  { %629 = vmatpush1.bf16.msra.mxu0 %v628_v34  ;;  %v650_v6 = vpack.c.bf16 %v307_v5, %v305_v4  ;;  %v652_v9 = vpack.c.bf16 %v306_v8, %v304_v7  ;;  %v409_v10 = vld [vmem:[#allocation10 + $0x80] sm:$0xff]  ;;  %v410_v11 = vld [vmem:[#allocation10 + $0x88] sm:$0xff]  ;;  %v411_v15 = vld [vmem:[#allocation10 + $0x90] sm:$0xff] }
  0x6b   :  { %621 = vmatpush3.bf16.msra.mxu1 %v620_v20  ;;  %631 = vmatprep.subr.bf16.mxu0 %v630_v35  ;;  %v393_v12 = vld [vmem:[#allocation10] sm:$0xff]  ;;  %v654_v13 = vpack.c.bf16 %v410_v11, %v409_v10  ;;  %v394_v14 = vld [vmem:[#allocation10 + $0x8] sm:$0xff]  ;;  %v412_v16 = vld [vmem:[#allocation10 + $0x98] sm:$0xff] }
  0x6c   :  { %v656_v17 = vpack.c.bf16 %v394_v14, %v393_v12  ;;  %v658_v18 = vpack.c.bf16 %v412_v16, %v411_v15  ;;  %v395_v19 = vld [vmem:[#allocation10 + $0x10] sm:$0xff]  ;;  %v396_v20 = vld [vmem:[#allocation10 + $0x18] sm:$0xff]  ;;  %v413_v21 = vld [vmem:[#allocation10 + $0xa0] sm:$0xff] }
  0x6d   :  { %655 = vmatprep.subr.bf16.mxu1 %v654_v13  ;;  %v414_v22 = vld [vmem:[#allocation10 + $0xa8] sm:$0xff]  ;;  %v660_v23 = vpack.c.bf16 %v396_v20, %v395_v19  ;;  %v397_v25 = vld [vmem:[#allocation10 + $0x20] sm:$0xff]  ;;  %v415_v27 = vld [vmem:[#allocation10 + $0xb0] sm:$0xff] }
  0x6e   :  { %633 = vmatpush1.bf16.msra.mxu0 %v632_v40  ;;  %v662_v24 = vpack.c.bf16 %v414_v22, %v413_v21  ;;  %v398_v26 = vld [vmem:[#allocation10 + $0x28] sm:$0xff]  ;;  %v416_v28 = vld [vmem:[#allocation10 + $0xb8] sm:$0xff]  ;;  %v399_v31 = vld [vmem:[#allocation10 + $0x30] sm:$0xff] }
  0x6f   :  { %635 = vmatprep.subr.bf16.mxu0 %v634_v41  ;;  %v664_v29 = vpack.c.bf16 %v398_v26, %v397_v25  ;;  %v666_v30 = vpack.c.bf16 %v416_v28, %v415_v27  ;;  %v400_v32 = vld [vmem:[#allocation10 + $0x38] sm:$0xff]  ;;  %v417_v33 = vld [vmem:[#allocation10 + $0xc0] sm:$0xff]  ;;  %v418_v34 = vld [vmem:[#allocation10 + $0xc8] sm:$0xff] }
  0x70   :  { %v668_v35 = vpack.c.bf16 %v400_v32, %v399_v31  ;;  %v670_v36 = vpack.c.bf16 %v418_v34, %v417_v33  ;;  %v401_v37 = vld [vmem:[#allocation10 + $0x40] sm:$0xff]  ;;  %v402_v38 = vld [vmem:[#allocation10 + $0x48] sm:$0xff]  ;;  %v419_v39 = vld [vmem:[#allocation10 + $0xd0] sm:$0xff] }
  0x71   :  { %v420_v40 = vld [vmem:[#allocation10 + $0xd8] sm:$0xff]  ;;  %v672_v41 = vpack.c.bf16 %v402_v38, %v401_v37  ;;  %v403_v43 = vld [vmem:[#allocation10 + $0x50] sm:$0xff]  ;;  %v421_v45 = vld [vmem:[#allocation10 + $0xe0] sm:$0xff] }
  0x72   :  { %637 = vmatpush1.bf16.msra.mxu0 %v636_v46  ;;  %v674_v42 = vpack.c.bf16 %v420_v40, %v419_v39  ;;  %v404_v44 = vld [vmem:[#allocation10 + $0x58] sm:$0xff]  ;;  %v422_v46 = vld [vmem:[#allocation10 + $0xe8] sm:$0xff]  ;;  %v405_v54 = vld [vmem:[#allocation10 + $0x60] sm:$0xff] }
  0x73   :  { %639 = vmatprep.subr.bf16.mxu0 %v638_v47  ;;  %v676_v47 = vpack.c.bf16 %v404_v44, %v403_v43  ;;  %v678_v48 = vpack.c.bf16 %v422_v46, %v421_v45  ;;  %v522_v49 = vld [vmem:[%s1006_s4] ss:$0 sm:$0xff]  ;;  %v406_v55 = vld [vmem:[#allocation10 + $0x68] sm:$0xff]  ;;  %v423_v57 = vld [vmem:[#allocation10 + $0xf0] sm:$0xff] }
  0x74   :  { %v680_v56 = vpack.c.bf16 %v406_v55, %v405_v54  ;;  %v407_v60 = vld [vmem:[#allocation10 + $0x70] sm:$0xff]  ;;  %v408_v61 = vld [vmem:[#allocation10 + $0x78] sm:$0xff] }
  0x75   :  { %v524_v13 = vld [vmem:[%s1010_s8] ss:$0 sm:$0xff] }
  0x76   :  { %641 = vmatpush1.bf16.msra.mxu0 %v640_v52 }
  0x77   :  { %643 = vmatprep.subr.bf16.mxu0 %v642_v53 }
  0x7a   :  { %645 = vmatpush1.bf16.msra.mxu0 %v644_v58  ;;  %v424_v58 = vld [vmem:[#allocation10 + $0xf8] sm:$0xff] }
  0x7b   :  { %647 = vmatprep.subr.bf16.mxu0 %v646_v59  ;;  %v682_v59 = vpack.c.bf16 %v424_v58, %v423_v57 }
  0x7e   :  { %649 = vmatpush1.bf16.msra.mxu0 %v648_v62  ;;  %v684_v62 = vpack.c.bf16 %v408_v61, %v407_v60 }
  0x7f   :  { %651 = vmatprep.subr.bf16.mxu0 %v650_v6 }
  0x82   :  { %653 = vmatpush1.bf16.msra.mxu0 %v652_v9 }
 0x138   :  { %v181_v0 = vpop.f32.mrb[0].mxu0 }
 0x139   :  { %v182_v1 = vadd.f32 %v520_v63, %v181_v0  ;;  %v584_v2 = vpop.f32.mrb[1].mxu0  ;;  %v310_v63 = vlaneseq }
 0x13a   :  { %v308_v2 = vld [vmem:[%s1008_s6] sm:$0x3]  ;;  %s809_s6 = scalar_lea.vmem %s510_s1, 128 }
 0x13b   :  { %v185_v3 = vmax.f32 %v182_v1, 0.0  ;;  %v311_v0 = vshrl.u32 %v310_v63, 7  ;;  %p810_p12 = scmp.ne.s32.totalorder %s510_s1, %s809_s6  ;;  %p815_p0 = scmp.lt.s32.totalorder %s809_s6, %s809_s6 }
 0x13d   :  { %602 = vmatmul.mubr.msk.f32.vlgmr.msra.gmra.mrb[0].mxu1 %vm201_vm2, %v185_v3  ;;  %v312_v1 = vsub.s32 0, %v311_v0  ;;  %v316_v3 = vsub.s32 1, %v311_v0  ;;  %p816_p1 = por %p815_p0, %p814_p13 }
 0x13e   :  { %657 = vmatpush3.bf16.msra.mxu1 %v656_v17 }
 0x13f   :  { %659 = vmatprep.subr.bf16.mxu1 %v658_v18  ;;  %v313_v4 = vrot.slane %v308_v2, %v312_v1  ;;  %v317_v5 = vrot.slane %v308_v2, %v316_v3  ;;  %p817_p2 = pnand %p816_p1, %p810_p12 }
 0x142   :  { %661 = vmatpush3.bf16.msra.mxu1 %v660_v23 }
 0x143   :  { %663 = vmatprep.subr.bf16.mxu1 %v662_v24 }
 0x146   :  { %665 = vmatpush3.bf16.msra.mxu1 %v664_v29 }
 0x147   :  { %667 = vmatprep.subr.bf16.mxu1 %v666_v30 }
 0x14a   :  { %669 = vmatpush3.bf16.msra.mxu1 %v668_v35 }
 0x14b   :  { %671 = vmatprep.subr.bf16.mxu1 %v670_v36 }
 0x14e   :  { %673 = vmatpush3.bf16.msra.mxu1 %v672_v41 }
 0x14f   :  { %675 = vmatprep.subr.bf16.mxu1 %v674_v42 }
 0x152   :  { %677 = vmatpush3.bf16.msra.mxu1 %v676_v47 }
 0x153   :  { %679 = vmatprep.subr.bf16.mxu1 %v678_v48 }
 0x156   :  { %681 = vmatpush3.bf16.msra.mxu1 %v680_v56 }
 0x157   :  { %683 = vmatprep.subr.bf16.mxu1 %v682_v59 }
 0x15a   :  { %685 = vmatpush3.bf16.msra.mxu1 %v684_v62 }
 0x210   :  { %v271_v50 = vpop.f32.mrb[0].mxu1 }
 0x211   :  { %v272_v51 = vadd.f32 %v522_v49, %v271_v50  ;;  %v603_v52 = vpop.f32.mrb[1].mxu1 }
 0x213   :  { %v275_v53 = vmax.f32 %v272_v51, 0.0 }
 0x215   :  { %385 = vmatmul.mubr.f32.vlgmr.msra.gmra.mrb[2].mxu0 %v275_v53 }
 0x2e8   :  { %v386_v6 = vpop.f32.mrb[2].mxu0 }
 0x2e9   :  { %v387_v7 = vadd.f32 %v386_v6, %v313_v4  ;;  %v388_v8 = vpop.f32.mrb[3].mxu0 }
 0x2ea   :  { %v389_v9 = vadd.f32 %v388_v8, %v317_v5 }
 0x2eb   :  { %v391_v11 = vmax.f32 %v387_v7, 0.0 }
 0x2ec   :  { %v392_v10 = vmax.f32 %v389_v9, 0.0 }
 0x2ee   :  { %496 = vmatprep.mubr.f32.mxu1 %v392_v10 }
 0x2ef   :  { %497 = vmatmul.mubr.f32.vlgmr.msra.gmra.mrb[2].mxu1 %v391_v11 }
 0x3c2   :  { %v571_v12 = vpop.f32.mrb[2].mxu1 }
 0x3c3   :  { %v572_v14 = vpop.f32.mrb[3].mxu1 }
 0x3c4   :  { %v573_v15 = vadd.f32 %v572_v14, %v571_v12 }
 0x3c6   :  { %v499_v16 = vadd.f32 %v573_v15, %v524_v13 }
 0x3c8   :  { %502 = vst [vmem:[#allocation11] sm:$0xff] %v499_v16 }
 0x3c9   :  { %820 = shalt.err (!%p817_p2)
}
 0x3ca   :  { %s821_s14 = scalar_lea.hbm %s1011_s9, 128 }
 0x3cb   :  { %p822_p3 = scmp.ne.s32.totalorder %s1011_s9, %s821_s14  ;;  %p825_p4 = scmp.lt.u32.totalorder %s821_s14, %s1011_s9 }
 0x3cd   :  { %p827_p5 = pnand %p825_p4, %p822_p3 }
 0x3cf   :  { %830 = shalt.err (!%p827_p5)
}
 0x3d0   :  { %512 = dma.vmem_to_hbm [thread:$0]  %s510_s1, 128, %s1011_s9, [#allocation4]  }
 0x3d1   :  { %837 = dma.done.wait [#allocation4], 128  }
 0x3d2   :  { %838 = vsyncadd [#allocation4], 4294967168 }
 0x3d3   :  { %516 = vsyncpa [#allocation3], 1 }
 0x3d4   :  { %517 = vsyncpa [#allocation6], 1 }
 0x3d5   :  { %518 = vsyncpa [#allocation9], 1 }
 0x3d6   :  { %519 = vsyncpa [#allocation4], 1 }

// kernel: tpu_custom_call.1
= control target key start
LH: loop header
LB: loop body
LE: loop exit
PB: predicated region body
PF: predicated region fallthrough
CT: control target
= control target key end

     0   :  { %14 = vsyncpa [#allocation3], 0  ;;  %s1002_s0 = inlined_call_operand.hbm [shape: f32[8,32], index: 0, kind: input, shape index: {}]   ;;  %s1003_s1 = inlined_call_operand.hbm [shape: f32[32,64], index: 1, kind: input, shape index: {}]   ;;  %s1004_s2 = inlined_call_operand.vmem [shape: f32[1,64], index: 2, kind: input, shape index: {}]   ;;  %s1005_s3 = inlined_call_operand.hbm [shape: f32[64,128], index: 3, kind: input, shape index: {}]   ;;  %s1006_s4 = inlined_call_operand.vmem [shape: f32[1,128], index: 4, kind: input, shape index: {}]   ;;  %s1007_s5 = inlined_call_operand.hbm [shape: f32[128,256], index: 5, kind: input, shape index: {}]   ;;  %s1008_s6 = inlined_call_operand.vmem [shape: f32[1,256], index: 6, kind: input, shape index: {}]   ;;  %s1009_s7 = inlined_call_operand.hbm [shape: f32[256,128], index: 7, kind: input, shape index: {}]   ;;  %s1010_s8 = inlined_call_operand.vmem [shape: f32[1,128], index: 8, kind: input, shape index: {}]   ;;  %s1011_s9 = inlined_call_operand.hbm [shape: f32[8,128], index: 9, kind: output, shape index: {}]  }
   0x1   :  { %15 = vsyncpa [#allocation6], 0 }
   0x2   :  { %16 = vsyncpa [#allocation9], 0 }
   0x3   :  { %17 = vsyncpa [#allocation4], 0  ;;  %s839_s30 = smov [#allocation5]   ;;  %s699_s13 = scalar_lea.hbm %s1003_s1, 512 }
   0x4   :  { %s33_s10 = sshll.u32 %s839_s30, 4  ;;  %p700_p0 = scmp.ne.s32.totalorder %s1003_s1, %s699_s13  ;;  %s34_s10 = int_to_ptr.vmem [resolvable:$true] %s33_s10 }
   0x5   :  { %p703_p1 = scmp.lt.u32.totalorder %s699_s13, %s1003_s1 }
   0x7   :  { %p705_p2 = pnand %p703_p1, %p700_p0 }
   0x9   :  { %708 = shalt.err (!%p705_p2)
}
   0xa   :  { %s709_s18 = scalar_lea.vmem %s34_s10, 512  ;;  %p714_p4 = scmp.lt.s32.totalorder %s34_s10, %s34_s10 }
   0xb   :  { %p710_p3 = scmp.ne.s32.totalorder %s34_s10, %s709_s18  ;;  %p715_p5 = scmp.lt.s32.totalorder %s709_s18, %s709_s18 }
   0xd   :  { %p716_p6 = por %p715_p5, %p714_p4 }
   0xf   :  { %p717_p7 = pnand %p716_p6, %p710_p3 }
  0x11   :  { %720 = shalt.err (!%p717_p7)
}
  0x12   :  { %s840_s19 = smov 128   ;;  %s841_s20 = smov 8  }
  0x13   :  { %39 = dma.hbm_to_vmem [thread:$0]  %s1003_s1, 512, %s34_s10, [#allocation6], %s840_s19, %s840_s19, %s841_s20  }
  0x14   :  { %s842_s23 = smov [#allocation8]   ;;  %s721_s27 = scalar_lea.hbm %s1007_s5, 4096 }
  0x15   :  { %s61_s24 = sshll.u32 %s842_s23, 4  ;;  %p722_p8 = scmp.ne.s32.totalorder %s1007_s5, %s721_s27  ;;  %s62_s24 = int_to_ptr.vmem [resolvable:$true] %s61_s24 }
  0x16   :  { %p725_p9 = scmp.lt.u32.totalorder %s721_s27, %s1007_s5 }
  0x18   :  { %p727_p10 = pnand %p725_p9, %p722_p8 }
  0x1a   :  { %730 = shalt.err (!%p727_p10)
}
  0x1b   :  { %s731_s12 = scalar_lea.vmem %s62_s24, 4096  ;;  %p736_p12 = scmp.lt.s32.totalorder %s62_s24, %s62_s24 }
  0x1c   :  { %p732_p11 = scmp.ne.s32.totalorder %s62_s24, %s731_s12  ;;  %p737_p13 = scmp.lt.s32.totalorder %s731_s12, %s731_s12 }
  0x1e   :  { %p738_p0 = por %p737_p13, %p736_p12 }
  0x20   :  { %p739_p1 = pnand %p738_p0, %p732_p11 }
  0x22   :  { %742 = shalt.err (!%p739_p1)
}
  0x23   :  { %s843_s1 = smov 256   ;;  %s844_s10 = smov 16  }
  0x24   :  { %67 = dma.hbm_to_vmem [thread:$0]  %s1007_s5, 4096, %s62_s24, [#allocation9], %s843_s1, %s843_s1, %s844_s10  }
  0x25   :  { %s845_s15 = smov [#allocation2]   ;;  %s846_s17 = smov [#allocation7]  }
  0x26   :  { %s24_s16 = sshll.u32 %s845_s15, 4  ;;  %s47_s18 = sshll.u32 %s846_s17, 4  ;;  %s25_s16 = int_to_ptr.vmem [resolvable:$true] %s24_s16  ;;  %s929_s18 = int_to_ptr.vmem [resolvable:$true] %s47_s18 }
  0x27   :  { %s743_s23 = scalar_lea.hbm %s1002_s0, 128 }
  0x28   :  { %p744_p2 = scmp.ne.s32.totalorder %s1002_s0, %s743_s23  ;;  %p747_p3 = scmp.lt.u32.totalorder %s743_s23, %s1002_s0 }
  0x2a   :  { %p749_p4 = pnand %p747_p3, %p744_p2 }
  0x2c   :  { %752 = shalt.err (!%p749_p4)
}
  0x2d   :  { %s753_s5 = scalar_lea.vmem %s25_s16, 128  ;;  %p758_p6 = scmp.lt.s32.totalorder %s25_s16, %s25_s16 }
  0x2e   :  { %p754_p5 = scmp.ne.s32.totalorder %s25_s16, %s753_s5  ;;  %p759_p7 = scmp.lt.s32.totalorder %s753_s5, %s753_s5 }
  0x30   :  { %p760_p8 = por %p759_p7, %p758_p6 }
  0x32   :  { %p761_p9 = pnand %p760_p8, %p754_p5 }
  0x34   :  { %764 = shalt.err (!%p761_p9)
}
  0x35   :  { %27 = dma.hbm_to_vmem [thread:$0]  %s1002_s0, 128, %s25_s16, [#allocation3]  }
  0x36   :  { %s765_s12 = scalar_lea.hbm %s1005_s3, 1024 }
  0x37   :  { %p766_p10 = scmp.ne.s32.totalorder %s1005_s3, %s765_s12  ;;  %p769_p11 = scmp.lt.u32.totalorder %s765_s12, %s1005_s3 }
  0x39   :  { %p771_p12 = pnand %p769_p11, %p766_p10 }
  0x3b   :  { %774 = shalt.err (!%p771_p12)
}
  0x3c   :  { %s775_s15 = scalar_lea.vmem %s929_s18, 1024  ;;  %p780_p0 = scmp.lt.s32.totalorder %s929_s18, %s929_s18 }
  0x3d   :  { %p776_p13 = scmp.ne.s32.totalorder %s929_s18, %s775_s15  ;;  %p781_p1 = scmp.lt.s32.totalorder %s775_s15, %s775_s15 }
  0x3f   :  { %p782_p2 = por %p781_p1, %p780_p0 }
  0x41   :  { %p783_p3 = pnand %p782_p2, %p776_p13 }
  0x43   :  { %786 = shalt.err (!%p783_p3)
}
  0x44   :  { %53 = dma.hbm_to_vmem [thread:$0]  %s1005_s3, 1024, %s929_s18, [#allocation6], %s840_s19, %s840_s19, %s841_s20  }
  0x45   :  { %s847_s17 = smov [#allocation10]   ;;  %s787_s25 = scalar_lea.hbm %s1009_s7, 4096 }
  0x46   :  { %s75_s21 = sshll.u32 %s847_s17, 4  ;;  %p788_p4 = scmp.ne.s32.totalorder %s1009_s7, %s787_s25  ;;  %s76_s21 = int_to_ptr.vmem [resolvable:$true] %s75_s21 }
  0x47   :  { %p791_p5 = scmp.lt.u32.totalorder %s787_s25, %s1009_s7 }
  0x49   :  { %p793_p6 = pnand %p791_p5, %p788_p4 }
  0x4b   :  { %796 = shalt.err (!%p793_p6)
}
  0x4c   :  { %s797_s24 = scalar_lea.vmem %s76_s21, 4096  ;;  %p802_p8 = scmp.lt.s32.totalorder %s76_s21, %s76_s21 }
  0x4d   :  { %p798_p7 = scmp.ne.s32.totalorder %s76_s21, %s797_s24  ;;  %p803_p9 = scmp.lt.s32.totalorder %s797_s24, %s797_s24 }
  0x4f   :  { %p804_p10 = por %p803_p9, %p802_p8 }
  0x51   :  { %p805_p11 = pnand %p804_p10, %p798_p7 }
  0x53   :  { %808 = shalt.err (!%p805_p11)
}
  0x54   :  { %81 = dma.hbm_to_vmem [thread:$0]  %s1009_s7, 4096, %s76_s21, [#allocation9], %s840_s19, %s840_s19, %s841_s20  }
  0x55   :  { %831 = dma.done.wait [#allocation3], 128  }
  0x56   :  { %832 = vsyncadd [#allocation3], 4294967168 }
  0x57   :  { %833 = dma.done.wait [#allocation6], 1536  }
  0x58   :  { %834 = vsyncadd [#allocation6], 4294965760 }
  0x59   :  { %835 = dma.done.wait [#allocation9], 8192  }
  0x5a   :  { %836 = vsyncadd [#allocation9], 4294959104  ;;  %v848_v0 = vmov 0.0|0.0   ;;  %vm849_vm0 = vmmov 0   ;;  %v850_v1 = vmov 0.0   ;;  %v100_v2 = vld [vmem:[#allocation5] sm:$0xff] }
  0x5b   :  { %604 = vmatprep.subr.bf16.mxu0 %v848_v0  ;;  %582 = vmatprep.mubr.msk.f32.mxu0 %vm849_vm0, %v850_v1  ;;  %v101_v3 = vld [vmem:[#allocation5 + $0x8] sm:$0xff]  ;;  %v102_v4 = vld [vmem:[#allocation5 + $0x10] sm:$0xff]  ;;  %v103_v6 = vld [vmem:[#allocation5 + $0x18] sm:$0xff]  ;;  %vm111_vm1 = vcmask 261120   ;;  %vm201_vm2 = vcmask 523264   ;;  %s851_s12 = smov [#allocation11]  }
  0x5c   :  { %610 = vmatprep.subr.bf16.mxu1 %v848_v0  ;;  %601 = vmatprep.mubr.msk.f32.mxu1 %vm849_vm0, %v850_v1  ;;  %v605_v5 = vpack.c.bf16 %v101_v3, %v100_v2  ;;  %v186_v7 = vld [vmem:[#allocation7] sm:$0xff]  ;;  %v187_v8 = vld [vmem:[#allocation7 + $0x8] sm:$0xff]  ;;  %v188_v9 = vld [vmem:[#allocation7 + $0x10] sm:$0xff]  ;;  %v608_v11 = vpack.c.bf16 %v103_v6, %v102_v4  ;;  %s509_s1 = sshll.u32 %s851_s12, 4  ;;  %s510_s1 = int_to_ptr.vmem [resolvable:$true] %s509_s1 }
  0x5d   :  { %v189_v10 = vld [vmem:[#allocation7 + $0x18] sm:$0xff]  ;;  %v611_v12 = vpack.c.bf16 %v187_v8, %v186_v7  ;;  %v190_v14 = vld [vmem:[#allocation7 + $0x20] sm:$0xff]  ;;  %v191_v15 = vld [vmem:[#allocation7 + $0x28] sm:$0xff]  ;;  %p814_p13 = scmp.lt.s32.totalorder %s510_s1, %s510_s1 }
  0x5e   :  { %606 = vmatpush3.bf16.msra.mxu0 %v605_v5  ;;  %v614_v13 = vpack.c.bf16 %v189_v10, %v188_v9  ;;  %v99_v16 = vld [vmem:[#allocation2] sm:$0xff]  ;;  %v617_v17 = vpack.c.bf16 %v191_v15, %v190_v14  ;;  %v192_v18 = vld [vmem:[#allocation7 + $0x30] sm:$0xff]  ;;  %v277_v21 = vld [vmem:[#allocation8 + $0x8] sm:$0xff] }
  0x5f   :  { %607 = vmatprep.subr.bf16.mxu0 %v848_v0  ;;  %612 = vmatpush3.bf16.msra.mxu1 %v611_v12  ;;  %v193_v19 = vld [vmem:[#allocation7 + $0x38] sm:$0xff]  ;;  %v276_v23 = vld [vmem:[#allocation8] sm:$0xff]  ;;  %v278_v25 = vld [vmem:[#allocation8 + $0x10] sm:$0xff] }
  0x60   :  { %613 = vmatprep.subr.bf16.mxu1 %v848_v0  ;;  %v620_v20 = vpack.c.bf16 %v193_v19, %v192_v18  ;;  %v279_v22 = vld [vmem:[#allocation8 + $0x18] sm:$0xff]  ;;  %v281_v26 = vld [vmem:[#allocation8 + $0x28] sm:$0xff]  ;;  %v624_v28 = vpack.c.bf16 %v278_v25, %v276_v23  ;;  %v280_v30 = vld [vmem:[#allocation8 + $0x20] sm:$0xff] }
  0x61   :  { %v622_v24 = vpack.c.bf16 %v279_v22, %v277_v21  ;;  %v283_v27 = vld [vmem:[#allocation8 + $0x38] sm:$0xff]  ;;  %v282_v31 = vld [vmem:[#allocation8 + $0x30] sm:$0xff]  ;;  %v285_v32 = vld [vmem:[#allocation8 + $0x48] sm:$0xff] }
  0x62   :  { %609 = vmatpush3.bf16.msra.mxu0 %v608_v11  ;;  %v626_v29 = vpack.c.bf16 %v283_v27, %v281_v26  ;;  %v287_v33 = vld [vmem:[#allocation8 + $0x58] sm:$0xff]  ;;  %v628_v34 = vpack.c.bf16 %v282_v31, %v280_v30  ;;  %v284_v36 = vld [vmem:[#allocation8 + $0x40] sm:$0xff]  ;;  %v286_v37 = vld [vmem:[#allocation8 + $0x50] sm:$0xff] }
  0x63   :  { %615 = vmatpush3.bf16.msra.mxu1 %v614_v13  ;;  %623 = vmatprep.subr.bf16.mxu0 %v622_v24  ;;  %v630_v35 = vpack.c.bf16 %v287_v33, %v285_v32  ;;  %v289_v38 = vld [vmem:[#allocation8 + $0x68] sm:$0xff]  ;;  %v291_v39 = vld [vmem:[#allocation8 + $0x78] sm:$0xff]  ;;  %v632_v40 = vpack.c.bf16 %v286_v37, %v284_v36  ;;  %v288_v42 = vld [vmem:[#allocation8 + $0x60] sm:$0xff] }
  0x64   :  { %616 = vmatprep.subr.bf16.mxu1 %v848_v0  ;;  %v634_v41 = vpack.c.bf16 %v291_v39, %v289_v38  ;;  %v290_v43 = vld [vmem:[#allocation8 + $0x70] sm:$0xff]  ;;  %v293_v44 = vld [vmem:[#allocation8 + $0x88] sm:$0xff]  ;;  %v295_v45 = vld [vmem:[#allocation8 + $0x98] sm:$0xff] }
  0x65   :  { %583 = vmatmul.mubr.msk.f32.vlgmr.msra.gmra.mrb[0].mxu0 %vm111_vm1, %v99_v16  ;;  %v636_v46 = vpack.c.bf16 %v290_v43, %v288_v42  ;;  %v638_v47 = vpack.c.bf16 %v295_v45, %v293_v44  ;;  %v292_v48 = vld [vmem:[#allocation8 + $0x80] sm:$0xff]  ;;  %v294_v49 = vld [vmem:[#allocation8 + $0x90] sm:$0xff]  ;;  %v297_v50 = vld [vmem:[#allocation8 + $0xa8] sm:$0xff] }
  0x66   :  { %384 = vmatprep.mubr.f32.mxu0 %v850_v1  ;;  %625 = vmatpush1.bf16.msra.mxu0 %v624_v28  ;;  %v299_v51 = vld [vmem:[#allocation8 + $0xb8] sm:$0xff]  ;;  %v640_v52 = vpack.c.bf16 %v294_v49, %v292_v48  ;;  %v296_v54 = vld [vmem:[#allocation8 + $0xa0] sm:$0xff]  ;;  %v298_v55 = vld [vmem:[#allocation8 + $0xb0] sm:$0xff] }
  0x67   :  { %618 = vmatpush3.bf16.msra.mxu1 %v617_v17  ;;  %627 = vmatprep.subr.bf16.mxu0 %v626_v29  ;;  %v642_v53 = vpack.c.bf16 %v299_v51, %v297_v50  ;;  %v301_v56 = vld [vmem:[#allocation8 + $0xc8] sm:$0xff]  ;;  %v303_v57 = vld [vmem:[#allocation8 + $0xd8] sm:$0xff]  ;;  %v644_v58 = vpack.c.bf16 %v298_v55, %v296_v54  ;;  %v300_v60 = vld [vmem:[#allocation8 + $0xc0] sm:$0xff] }
  0x68   :  { %619 = vmatprep.subr.bf16.mxu1 %v848_v0  ;;  %v646_v59 = vpack.c.bf16 %v303_v57, %v301_v56  ;;  %v302_v61 = vld [vmem:[#allocation8 + $0xd0] sm:$0xff]  ;;  %v520_v63 = vld [vmem:[%s1004_s2] ss:$0 sm:$0xff]  ;;  %v305_v4 = vld [vmem:[#allocation8 + $0xe8] sm:$0xff] }
  0x69   :  { %v648_v62 = vpack.c.bf16 %v302_v61, %v300_v60  ;;  %v307_v5 = vld [vmem:[#allocation8 + $0xf8] sm:$0xff]  ;;  %v304_v7 = vld [vmem:[#allocation8 + $0xe0] sm:$0xff]  ;;  %v306_v8 = vld [vmem:[#allocation8 + $0xf0] sm:$0xff] }
  0x6a   :  { %629 = vmatpush1.bf16.msra.mxu0 %v628_v34  ;;  %v650_v6 = vpack.c.bf16 %v307_v5, %v305_v4  ;;  %v652_v9 = vpack.c.bf16 %v306_v8, %v304_v7  ;;  %v409_v10 = vld [vmem:[#allocation10 + $0x80] sm:$0xff]  ;;  %v410_v11 = vld [vmem:[#allocation10 + $0x88] sm:$0xff]  ;;  %v411_v15 = vld [vmem:[#allocation10 + $0x90] sm:$0xff] }
  0x6b   :  { %621 = vmatpush3.bf16.msra.mxu1 %v620_v20  ;;  %631 = vmatprep.subr.bf16.mxu0 %v630_v35  ;;  %v393_v12 = vld [vmem:[#allocation10] sm:$0xff]  ;;  %v654_v13 = vpack.c.bf16 %v410_v11, %v409_v10  ;;  %v394_v14 = vld [vmem:[#allocation10 + $0x8] sm:$0xff]  ;;  %v412_v16 = vld [vmem:[#allocation10 + $0x98] sm:$0xff] }
  0x6c   :  { %v656_v17 = vpack.c.bf16 %v394_v14, %v393_v12  ;;  %v658_v18 = vpack.c.bf16 %v412_v16, %v411_v15  ;;  %v395_v19 = vld [vmem:[#allocation10 + $0x10] sm:$0xff]  ;;  %v396_v20 = vld [vmem:[#allocation10 + $0x18] sm:$0xff]  ;;  %v413_v21 = vld [vmem:[#allocation10 + $0xa0] sm:$0xff] }
  0x6d   :  { %655 = vmatprep.subr.bf16.mxu1 %v654_v13  ;;  %v414_v22 = vld [vmem:[#allocation10 + $0xa8] sm:$0xff]  ;;  %v660_v23 = vpack.c.bf16 %v396_v20, %v395_v19  ;;  %v397_v25 = vld [vmem:[#allocation10 + $0x20] sm:$0xff]  ;;  %v415_v27 = vld [vmem:[#allocation10 + $0xb0] sm:$0xff] }
  0x6e   :  { %633 = vmatpush1.bf16.msra.mxu0 %v632_v40  ;;  %v662_v24 = vpack.c.bf16 %v414_v22, %v413_v21  ;;  %v398_v26 = vld [vmem:[#allocation10 + $0x28] sm:$0xff]  ;;  %v416_v28 = vld [vmem:[#allocation10 + $0xb8] sm:$0xff]  ;;  %v399_v31 = vld [vmem:[#allocation10 + $0x30] sm:$0xff] }
  0x6f   :  { %635 = vmatprep.subr.bf16.mxu0 %v634_v41  ;;  %v664_v29 = vpack.c.bf16 %v398_v26, %v397_v25  ;;  %v666_v30 = vpack.c.bf16 %v416_v28, %v415_v27  ;;  %v400_v32 = vld [vmem:[#allocation10 + $0x38] sm:$0xff]  ;;  %v417_v33 = vld [vmem:[#allocation10 + $0xc0] sm:$0xff]  ;;  %v418_v34 = vld [vmem:[#allocation10 + $0xc8] sm:$0xff] }
  0x70   :  { %v668_v35 = vpack.c.bf16 %v400_v32, %v399_v31  ;;  %v670_v36 = vpack.c.bf16 %v418_v34, %v417_v33  ;;  %v401_v37 = vld [vmem:[#allocation10 + $0x40] sm:$0xff]  ;;  %v402_v38 = vld [vmem:[#allocation10 + $0x48] sm:$0xff]  ;;  %v419_v39 = vld [vmem:[#allocation10 + $0xd0] sm:$0xff] }
  0x71   :  { %v420_v40 = vld [vmem:[#allocation10 + $0xd8] sm:$0xff]  ;;  %v672_v41 = vpack.c.bf16 %v402_v38, %v401_v37  ;;  %v403_v43 = vld [vmem:[#allocation10 + $0x50] sm:$0xff]  ;;  %v421_v45 = vld [vmem:[#allocation10 + $0xe0] sm:$0xff] }
  0x72   :  { %637 = vmatpush1.bf16.msra.mxu0 %v636_v46  ;;  %v674_v42 = vpack.c.bf16 %v420_v40, %v419_v39  ;;  %v404_v44 = vld [vmem:[#allocation10 + $0x58] sm:$0xff]  ;;  %v422_v46 = vld [vmem:[#allocation10 + $0xe8] sm:$0xff]  ;;  %v405_v54 = vld [vmem:[#allocation10 + $0x60] sm:$0xff] }
  0x73   :  { %639 = vmatprep.subr.bf16.mxu0 %v638_v47  ;;  %v676_v47 = vpack.c.bf16 %v404_v44, %v403_v43  ;;  %v678_v48 = vpack.c.bf16 %v422_v46, %v421_v45  ;;  %v522_v49 = vld [vmem:[%s1006_s4] ss:$0 sm:$0xff]  ;;  %v406_v55 = vld [vmem:[#allocation10 + $0x68] sm:$0xff]  ;;  %v423_v57 = vld [vmem:[#allocation10 + $0xf0] sm:$0xff] }
  0x74   :  { %v680_v56 = vpack.c.bf16 %v406_v55, %v405_v54  ;;  %v407_v60 = vld [vmem:[#allocation10 + $0x70] sm:$0xff]  ;;  %v408_v61 = vld [vmem:[#allocation10 + $0x78] sm:$0xff] }
  0x75   :  { %v524_v13 = vld [vmem:[%s1010_s8] ss:$0 sm:$0xff] }
  0x76   :  { %641 = vmatpush1.bf16.msra.mxu0 %v640_v52 }
  0x77   :  { %643 = vmatprep.subr.bf16.mxu0 %v642_v53 }
  0x7a   :  { %645 = vmatpush1.bf16.msra.mxu0 %v644_v58  ;;  %v424_v58 = vld [vmem:[#allocation10 + $0xf8] sm:$0xff] }
  0x7b   :  { %647 = vmatprep.subr.bf16.mxu0 %v646_v59  ;;  %v682_v59 = vpack.c.bf16 %v424_v58, %v423_v57 }
  0x7e   :  { %649 = vmatpush1.bf16.msra.mxu0 %v648_v62  ;;  %v684_v62 = vpack.c.bf16 %v408_v61, %v407_v60 }
  0x7f   :  { %651 = vmatprep.subr.bf16.mxu0 %v650_v6 }
  0x82   :  { %653 = vmatpush1.bf16.msra.mxu0 %v652_v9 }
 0x138   :  { %v181_v0 = vpop.f32.mrb[0].mxu0 }
 0x139   :  { %v182_v1 = vadd.f32 %v520_v63, %v181_v0  ;;  %v584_v2 = vpop.f32.mrb[1].mxu0  ;;  %v310_v63 = vlaneseq }
 0x13a   :  { %v308_v2 = vld [vmem:[%s1008_s6] sm:$0x3]  ;;  %s809_s6 = scalar_lea.vmem %s510_s1, 128 }
 0x13b   :  { %v185_v3 = vmax.f32 %v182_v1, 0.0  ;;  %v311_v0 = vshrl.u32 %v310_v63, 7  ;;  %p810_p12 = scmp.ne.s32.totalorder %s510_s1, %s809_s6  ;;  %p815_p0 = scmp.lt.s32.totalorder %s809_s6, %s809_s6 }
 0x13d   :  { %602 = vmatmul.mubr.msk.f32.vlgmr.msra.gmra.mrb[0].mxu1 %vm201_vm2, %v185_v3  ;;  %v312_v1 = vsub.s32 0, %v311_v0  ;;  %v316_v3 = vsub.s32 1, %v311_v0  ;;  %p816_p1 = por %p815_p0, %p814_p13 }
 0x13e   :  { %657 = vmatpush3.bf16.msra.mxu1 %v656_v17 }
 0x13f   :  { %659 = vmatprep.subr.bf16.mxu1 %v658_v18  ;;  %v313_v4 = vrot.slane %v308_v2, %v312_v1  ;;  %v317_v5 = vrot.slane %v308_v2, %v316_v3  ;;  %p817_p2 = pnand %p816_p1, %p810_p12 }
 0x142   :  { %661 = vmatpush3.bf16.msra.mxu1 %v660_v23 }
 0x143   :  { %663 = vmatprep.subr.bf16.mxu1 %v662_v24 }
 0x146   :  { %665 = vmatpush3.bf16.msra.mxu1 %v664_v29 }
 0x147   :  { %667 = vmatprep.subr.bf16.mxu1 %v666_v30 }
 0x14a   :  { %669 = vmatpush3.bf16.msra.mxu1 %v668_v35 }
 0x14b   :  { %671 = vmatprep.subr.bf16.mxu1 %v670_v36 }
 0x14e   :  { %673 = vmatpush3.bf16.msra.mxu1 %v672_v41 }
 0x14f   :  { %675 = vmatprep.subr.bf16.mxu1 %v674_v42 }
 0x152   :  { %677 = vmatpush3.bf16.msra.mxu1 %v676_v47 }
 0x153   :  { %679 = vmatprep.subr.bf16.mxu1 %v678_v48 }
 0x156   :  { %681 = vmatpush3.bf16.msra.mxu1 %v680_v56 }
 0x157   :  { %683 = vmatprep.subr.bf16.mxu1 %v682_v59 }
 0x15a   :  { %685 = vmatpush3.bf16.msra.mxu1 %v684_v62 }
 0x210   :  { %v271_v50 = vpop.f32.mrb[0].mxu1 }
 0x211   :  { %v272_v51 = vadd.f32 %v522_v49, %v271_v50  ;;  %v603_v52 = vpop.f32.mrb[1].mxu1 }
 0x213   :  { %v275_v53 = vmax.f32 %v272_v51, 0.0 }
 0x215   :  { %385 = vmatmul.mubr.f32.vlgmr.msra.gmra.mrb[2].mxu0 %v275_v53 }
 0x2e8   :  { %v386_v6 = vpop.f32.mrb[2].mxu0 }
 0x2e9   :  { %v387_v7 = vadd.f32 %v386_v6, %v313_v4  ;;  %v388_v8 = vpop.f32.mrb[3].mxu0 }
 0x2ea   :  { %v389_v9 = vadd.f32 %v388_v8, %v317_v5 }
 0x2eb   :  { %v391_v11 = vmax.f32 %v387_v7, 0.0 }
 0x2ec   :  { %v392_v10 = vmax.f32 %v389_v9, 0.0 }
 0x2ee   :  { %496 = vmatprep.mubr.f32.mxu1 %v392_v10 }
 0x2ef   :  { %497 = vmatmul.mubr.f32.vlgmr.msra.gmra.mrb[2].mxu1 %v391_v11 }
 0x3c2   :  { %v571_v12 = vpop.f32.mrb[2].mxu1 }
 0x3c3   :  { %v572_v14 = vpop.f32.mrb[3].mxu1 }
 0x3c4   :  { %v573_v15 = vadd.f32 %v572_v14, %v571_v12 }
 0x3c6   :  { %v499_v16 = vadd.f32 %v573_v15, %v524_v13 }
 0x3c8   :  { %502 = vst [vmem:[#allocation11] sm:$0xff] %v499_v16 }
 0x3c9   :  { %820 = shalt.err (!%p817_p2)
}
 0x3ca   :  { %s821_s14 = scalar_lea.hbm %s1011_s9, 128 }
 0x3cb   :  { %p822_p3 = scmp.ne.s32.totalorder %s1011_s9, %s821_s14  ;;  %p825_p4 = scmp.lt.u32.totalorder %s821_s14, %s1011_s9 }
 0x3cd   :  { %p827_p5 = pnand %p825_p4, %p822_p3 }
 0x3cf   :  { %830 = shalt.err (!%p827_p5)
}
 0x3d0   :  { %512 = dma.vmem_to_hbm [thread:$0]  %s510_s1, 128, %s1011_s9, [#allocation4]  }
 0x3d1   :  { %837 = dma.done.wait [#allocation4], 128  }
 0x3d2   :  { %838 = vsyncadd [#allocation4], 4294967168 }
 0x3d3   :  { %516 = vsyncpa [#allocation3], 1 }
 0x3d4   :  { %517 = vsyncpa [#allocation6], 1 }
 0x3d5   :  { %518 = vsyncpa [#allocation9], 1 }
 0x3d6   :  { %519 = vsyncpa [#allocation4], 1 }

</bundles_post_ra>
